<compile_context>
chip_gen: v7x
topology: tpu7x:2x2x1
jax: 0.10.0
libtpu: 0.0.40
codegen_flags: <defaults>
</compile_context>

<pallas_src>
import jax
import jax.numpy as jnp
from jax.experimental import pallas as pl
from jax.experimental.pallas import tpu as pltpu


# ---------------------------------------------------------------------------
# Kernels
# ---------------------------------------------------------------------------

def _sum_kernel_single(h_ref, o_ref):
    # Whole sample axis in one block: one reduce, one lane-dense store.
    o_ref[...] = jnp.sum(h_ref[...], axis=1, dtype=jnp.float32).astype(o_ref.dtype)


def _sum_kernel_stream_f32(h_ref, o_ref):
    # f32 output: the output block index is independent of k, so the block stays
    # VMEM-resident across the reduction sweep -- accumulate into it directly.
    part = jnp.sum(h_ref[...], axis=1, dtype=jnp.float32)

    @pl.when(pl.program_id(2) == 0)
    def _():
        o_ref[...] = part

    @pl.when(pl.program_id(2) != 0)
    def _():
        o_ref[...] += part


def _sum_kernel_stream_acc(h_ref, o_ref, acc_ref):
    # Sub-f32 output: accumulate in an f32 VMEM scratch, cast + store once.
    k = pl.program_id(2)
    part = jnp.sum(h_ref[...], axis=1, dtype=jnp.float32)

    @pl.when(k == 0)
    def _():
        acc_ref[...] = part

    @pl.when(k != 0)
    def _():
        acc_ref[...] += part

    @pl.when(k == pl.num_programs(2) - 1)
    def _():
        o_ref[...] = acc_ref[...].astype(o_ref.dtype)


# ---------------------------------------------------------------------------
# Wrapper
# ---------------------------------------------------------------------------

def _round_up(x, m):
    return ((x + m - 1) // m) * m


def _sublane_align(dtype):
    bits = jnp.dtype(dtype).itemsize * 8
    if bits >= 32:
        return 8
    if bits == 16:
        return 16
    return 32


def sum_averaging(h, *, emb_dim, num_samples, tb=None, ts=None, te=None,
                  tile_budget_bytes=6 * 1024 * 1024,
                  vmem_limit_bytes=40 * 1024 * 1024):
    """JAX/Pallas equivalent of SumAveraging.forward(h)."""
    assert h.ndim == 2
    rows, e = h.shape
    assert e == emb_dim
    assert rows % num_samples == 0
    b = rows // num_samples
    s = num_samples
    dtype = h.dtype
    itemsize = jnp.dtype(dtype).itemsize

    in_align = _sublane_align(dtype)    # sublane axis (S) of the 3-D input block
    out_align = _sublane_align(dtype)   # sublane axis (B) of the 2-D output block

    # --- lane (E) axis: full-E, lane-dense blocks; only split a very large E. ---
    if te is None:
        e128 = _round_up(e, 128)
        te = e128 if e128 <= 4096 else 1024
    e_pad = _round_up(e, te)
    j_tiles = e_pad // te
    row_bytes = te * itemsize

    # --- sample (S) axis ---
    if ts is None:
        if out_align * s * row_bytes <= tile_budget_bytes:
            ts = s                       # whole sample axis in one block (common)
        else:
            ts = max(in_align,
                     (tile_budget_bytes // (out_align * row_bytes))
                     // in_align * in_align)
    s_pad = _round_up(s, ts)
    s_tiles = s_pad // ts

    # --- batch (B) axis: fill the per-buffer budget, keep >=2 (i, j) tiles. ---
    if tb is None:
        tb = max(out_align,
                 (tile_budget_bytes // (ts * row_bytes)) // out_align * out_align)
        tb = min(tb, 512)
        if j_tiles == 1 and b >= 2 * out_align:
            # At least two parallel i-tiles so both v7x TensorCores get work.
            tb = min(tb, _round_up(pl.cdiv(b, 2), out_align))
        tb = min(tb, _round_up(b, out_align))
        if b < out_align:
            tb = b                       # full-dim block is legal; no padding
    b_pad = _round_up(b, tb)
    i_tiles = b_pad // tb

    # --- metadata-only reshape, then pad only if a dimension is ragged. ---
    h3 = h.reshape(b, s, e)
    pad_b, pad_s, pad_e = b_pad - b, s_pad - s, e_pad - e
    if pad_b or pad_s or pad_e:
        # Zero padding is exact for a sum; it costs one extra HBM copy of the
        # input but buys evenly divisible tiles and lane-dense (128-wide) stores.
        h3 = jnp.pad(h3, ((0, pad_b), (0, pad_s), (0, pad_e)))

    grid_steps = i_tiles * j_tiles * s_tiles
    # Third input buffer once the pipeline is deep enough (hides DMA issue latency
    # on v7x; harmless elsewhere; costs one extra input tile of VMEM).
    in_spec_kw = {"pipeline_mode": pl.Buffered(3)} if grid_steps >= 4 else {}

    if s_tiles == 1:
        # 2-D grid: no reduction axis, no scratch, no pl.when.
        kernel = _sum_kernel_single
        grid = (i_tiles, j_tiles)
        in_specs = [pl.BlockSpec((tb, ts, te), lambda i, j: (i, 0, j), **in_spec_kw)]
        out_specs = pl.BlockSpec((tb, te), lambda i, j: (i, j))
        scratch_shapes = []
        dim_sems = ("parallel", "parallel")
    else:
        # 3-D grid: samples streamed on the last ("arbitrary") axis.
        grid = (i_tiles, j_tiles, s_tiles)
        in_specs = [pl.BlockSpec((tb, ts, te), lambda i, j, k: (i, k, j), **in_spec_kw)]
        out_specs = pl.BlockSpec((tb, te), lambda i, j, k: (i, j))
        dim_sems = ("parallel", "parallel", "arbitrary")
        if dtype == jnp.float32:
            kernel = _sum_kernel_stream_f32
            scratch_shapes = []
        else:
            kernel = _sum_kernel_stream_acc
            scratch_shapes = [pltpu.VMEM((tb, te), jnp.float32)]

    out = pl.pallas_call(
        kernel,
        out_shape=jax.ShapeDtypeStruct((b_pad, e_pad), dtype),
        grid_spec=pltpu.PrefetchScalarGridSpec(
            num_scalar_prefetch=0,
            grid=grid,
            in_specs=in_specs,
            out_specs=out_specs,
            scratch_shapes=scratch_shapes,
        ),
        compiler_params=pltpu.CompilerParams(
            dimension_semantics=dim_sems,
            vmem_limit_bytes=vmem_limit_bytes,
        ),
    )(h3)

    if pad_b or pad_e:
        out = out[:b, :e]
    return out


# ---------------------------------------------------------------------------
# Demo / self-test
# ---------------------------------------------------------------------------

if __name__ == "__main__":
    key = jax.random.PRNGKey(0)
    k1, k2, k3, k4 = jax.random.split(key, 4)

    def ref_sum(h, num_samples, emb_dim):
        h3 = h.reshape(-1, num_samples, emb_dim)
        return h3.astype(jnp.float32).sum(axis=1).astype(h.dtype)

    # 1) Common case: aligned f32 -> 2-D grid, single-S block, 2 parallel i-tiles.
    e1, s1, b1 = 128, 8, 16
    h1 = jax.random.normal(k1, (b1 * s1, e1), dtype=jnp.float32)
    o1 = jax.block_until_ready(sum_averaging(h1, emb_dim=e1, num_samples=s1))
    assert o1.shape == (b1, e1)
    assert jnp.allclose(o1, ref_sum(h1, s1, e1), atol=1e-5, rtol=1e-5)

    # 2) Ragged bf16 case: E=96 padded to 128, odd B/S handled by zero padding.
    e2, s2, b2 = 96, 5, 10
    h2 = jax.random.normal(k2, (b2 * s2, e2), dtype=jnp.bfloat16)
    o2 = jax.block_until_ready(sum_averaging(h2, emb_dim=e2, num_samples=s2))
    assert o2.shape == (b2, e2)
    assert jnp.allclose(o2.astype(jnp.float32),
                        ref_sum(h2, s2, e2).astype(jnp.float32),
                        atol=5e-2, rtol=5e-2)

    # 3) Forced streaming reduction (f32): in-place accumulation into o_ref,
    #    grid deep enough to exercise the 3-deep input pipeline.
    e3, s3, b3 = 128, 16, 32
    h3_ = jax.random.normal(k3, (b3 * s3, e3), dtype=jnp.float32)
    o3 = jax.block_until_ready(
        sum_averaging(h3_, emb_dim=e3, num_samples=s3, tb=8, ts=8))
    assert jnp.allclose(o3, ref_sum(h3_, s3, e3), atol=1e-4, rtol=1e-5)

    # 4) Forced streaming reduction (bf16): f32 VMEM accumulator path.
    e4, s4, b4 = 256, 16, 16
    h4 = jax.random.normal(k4, (b4 * s4, e4), dtype=jnp.bfloat16)
    o4 = jax.block_until_ready(
        sum_averaging(h4, emb_dim=e4, num_samples=s4, tb=16, ts=8))
    assert jnp.allclose(o4.astype(jnp.float32),
                        ref_sum(h4, s4, e4).astype(jnp.float32),
                        atol=1e-1, rtol=5e-2)

    print("KERNEL_OK")
</pallas_src>

<mosaic_0001>
module attributes {stable_mosaic.version = 11 : i64} {
  func.func @_sum_kernel_single(%arg0: i32, %arg1: i32, %arg2: memref<8x8x128xf32, #tpu.memory_space<vmem>>, %arg3: memref<8x128xf32, #tpu.memory_space<vmem>>) attributes {dimension_semantics = [#tpu.dimension_semantics<parallel>, #tpu.dimension_semantics<parallel>], iteration_bounds = array<i64: 2, 1>, scalar_prefetch = 0 : i64, scratch_operands = 0 : i64, tpu.core_type = #tpu.core_type<tc>, window_params = [{transform_indices = @transform_0, window_bounds = array<i64: 8, 8, 128>}, {transform_indices = @transform_1, window_bounds = array<i64: 8, 128>}]} {
    %c0 = arith.constant 0 : index
    %c0_0 = arith.constant 0 : index
    %c0_1 = arith.constant 0 : index
    %0 = vector.load %arg2[%c0, %c0_0, %c0_1] : memref<8x8x128xf32, #tpu.memory_space<vmem>>, vector<8x8x128xf32>
    %cst = arith.constant dense<0.000000e+00> : vector<8x128xf32>
    %1 = vector.multi_reduction <add>, %0, %cst [1] : vector<8x8x128xf32> to vector<8x128xf32>
    %c0_2 = arith.constant 0 : index
    %c0_3 = arith.constant 0 : index
    %2 = vector.load %arg3[%c0_2, %c0_3] : memref<8x128xf32, #tpu.memory_space<vmem>>, vector<8x128xf32>
    tpu.vector_store %arg3[%c0_2, %c0_3], %1 {strides = array<i32>} : memref<8x128xf32, #tpu.memory_space<vmem>>, vector<8x128xf32>,
    return
  }
  func.func @transform_0(%arg0: i32, %arg1: i32) -> (i32, i32, i32) {
    %c0_i32 = arith.constant 0 : i32
    %c0_i32_0 = arith.constant 0 : i32
    return %arg0, %c0_i32, %arg1 : i32, i32, i32
  }
  func.func @transform_1(%arg0: i32, %arg1: i32) -> (i32, i32) {
    %c0_i32 = arith.constant 0 : i32
    return %arg0, %arg1 : i32, i32
  }
}

</mosaic_0001>

<bundles_post_ra>
// kernel: tpu_custom_call.1
= control target key start
LH: loop header
LB: loop body
LE: loop exit
PB: predicated region body
PF: predicated region fallthrough
CT: control target
= control target key end

     0   :  { %6 = vsyncpa [#allocation3], 0  ;;  %s712_s0 = inlined_call_operand.hbm [shape: f32[16,8,128], index: 0, kind: input, shape index: {}]   ;;  %s713_s1 = inlined_call_operand.hbm [shape: f32[16,128], index: 1, kind: output, shape index: {}]  }
   0x1   :  { %8 = vsyncpa [#allocation3 + $0x1], 0 }
   0x2   :  { %9 = vsyncpa [#allocation4], 0 }
   0x3   :  { %11 = vsyncpa [#allocation4 + $0x1], 0  ;;  %s536_s6 = smov 0   ;;  %s538_s7 = smov 0  }
   0x4   :  { %s540_s8 = smov 0   ;;  %s542_s9 = smov 0  }
   0x5   :  { %s544_s10 = smov 0   ;;  %s546_s11 = smov 0  }
   0x6 LB: > { %s329_s12 = sadd.s32 4294967295, %s520_s11   ;;  %s330_s13 = sadd.s32 4294967294, %s520_s11   ;;  %s520_s11 = sphi %s546_s11, %s17_s11   ;;  %s516_s10 = sphi %s544_s10, %s728_s10   ;;  %s512_s9 = sphi %s542_s9, %s727_s9   ;;  %s508_s8 = sphi %s540_s8, %s726_s8   ;;  %s504_s7 = sphi %s538_s7, %s725_s7   ;;  %s500_s6 = sphi %s536_s6, %s724_s6  }
   0x7   : > { %s29_s14 = sadd.s32 1, %s516_s10  ;;  %s38_s15 = sadd.s32 1, %s508_s8 }
   0x8   : > { %p31_p0 = scmp.ge.s32.totalorder %s29_s14, 2  ;;  %p45_p1 = scmp.ne.s32.totalorder %s508_s8, %s504_s7 }
   0x9   : > { %p46_p2 = scmp.eq.s32.totalorder %s520_s11, 0  ;;  %p51_p3 = scmp.ne.s32.totalorder %s504_s7, %s500_s6 }
   0xa   : > { %s730_s14 = smov (%p31_p0, %s29_s14), 0  ;;  %p52_p5 = scmp.eq.s32.totalorder %s329_s12, 0 }
   0xb   : > { %p577_p4 = por %p46_p2, %p45_p1  ;;  %s33_s17 = ssub.s32 %s516_s10, %s730_s14 }
   0xc   : > { %p77_p6 = scmp.eq.s32.totalorder %s329_s12, 1  ;;  %p36_p7 = scmp.eq.s32.totalorder %s33_s17, 0 }
   0xd   : > { %p583_p8 = por %p52_p5, %p51_p3  ;;  %p83_p10 = scmp.eq.s32.totalorder %s330_s13, 1 }
   0xe   : > { %p587_p9 = por %p77_p6, %p45_p1  ;;  %p356_p13 = scmp.lt.s32.totalorder %s520_s11, 2 }
   0xf   : > { %s592_s20 = scalar_select %p36_p7, %s508_s8, %s38_s15  }
  0x10   : > { %s717_s19 = scalar_select %p587_p9, 1, 0 }
  0x11   : > { %p594_p11 = por %p83_p10, %p51_p3  ;;  %s103_s22 = sand.u32 1, %s508_s8  }
  0x12   : > { %s333_s23 = sshll.u32 %s103_s22, 6  ;;  %s343_s24 = sshll.u32 %s516_s10, 10 }
  0x13   : > { %s718_s21 = scalar_select %p594_p11, 1, 0 }
  0x14   : > { %s605_s27 = scalar_lea.hbm %s712_s0, %s343_s24  ;;  %s107_s28 = scalar_lea.vmem [#allocation2], %s333_s23 }
  0x15   : > { %s115_s29 = sshll.u32 %s107_s28, 4  ;;  %p611_p0 = pnand %p356_p13, %p577_p4  ;;  %s607_s29 = int_to_ptr.vmem [resolvable:$true] %s115_s29 }
  0x16   : > { %s616_s2 = scalar_lea.sflag [#allocation3], %s103_s22  ;;  %s408_s3 = scalar_lea.hbm %s605_s27, 1024 }
  0x17   : > { %p409_p2 = scmp.ne.s32.totalorder %s605_s27, %s408_s3  ;;  %p410_p3 = pneg %p611_p0 }
  0x18   : > { %s413_s12 = scalar_lea.hbm %s712_s0, 2048  ;;  %p414_p4 = scmp.lt.u32.totalorder %s605_s27, %s712_s0 }
  0x19   : > { %p411_p5 = pnand %p410_p3, %p409_p2  ;;  %p415_p7 = scmp.lt.u32.totalorder %s413_s12, %s408_s3 }
  0x1a   : > { %p417_p13 = scmp.lt.u32.totalorder %s408_s3, %s605_s27 }
  0x1b   : > { %p412_p6 = pneg %p411_p5  ;;  %p416_p10 = por %p415_p7, %p414_p4 }
  0x1d   : > { %p418_p12 = por %p417_p13, %p416_p10 }
  0x1f   : > { %p419_p1 = pnand %p418_p12, %p412_p6 }
  0x21   : > { %422 = shalt.err (!%p419_p1)
}
  0x22   : > { %s423_s16 = scalar_lea.vmem %s607_s29, 1024  ;;  %s522_s17 = smov [#allocation2]  }
  0x23   : > { %p424_p2 = scmp.ne.s32.totalorder %s607_s29, %s423_s16  ;;  %s428_s22 = sshll.u32 %s522_s17, 4  ;;  %s429_s22 = int_to_ptr.vmem [resolvable:$false] %s428_s22 }
  0x24   : > { %s430_s23 = scalar_lea.vmem %s429_s22, 2048  ;;  %p431_p9 = scmp.lt.s32.totalorder %s607_s29, %s429_s22 }
  0x25   : > { %p426_p5 = pnand %p424_p2, %p410_p3  ;;  %p432_p4 = scmp.lt.s32.totalorder %s430_s23, %s423_s16 }
  0x27   : > { %p427_p11 = pneg %p426_p5  ;;  %p433_p7 = por %p432_p4, %p431_p9 }
  0x29   : > { %p434_p10 = pnand %p433_p7, %p427_p11 }
  0x2b   : > { %437 = shalt.err (!%p434_p10)
}
  0x2c   : > { %s523_s24 = smov 128   ;;  %s524_s25 = smov 8  }
  0x2d   : > { %351 = dma.hbm_to_vmem [thread:$0]  (!%p611_p0), %s605_s27, 1024, %s607_s29, %s616_s2, %s523_s24, %s523_s24, %s524_s25  }
  0x2e   : > { %p123_p12 = scmp.lt.s32.totalorder %s520_s11, 3  ;;  %p720_p1 = scmp.ge.s32.totalorder %s520_s11, 1 }
  0x30   : > { %p124_p3 = pnand %p720_p1, %p123_p12 }
  0x31   : > { %s648_s26 = sand.u32 (!%p124_p3), 1, %s504_s7  }
  0x32   : > { %127 = sbr.rel (%p124_p3) target bundleno = 92 (0x5c), region = 24  ;;  %s337_s28 = sshll.u32 (!%p124_p3), %s648_s26, 6 }
  0x33   : > { %s130_s3 = scalar_lea.sflag (!%p124_p3), [#allocation3], %s648_s26  ;;  %s133_s4 = scalar_lea.vmem (!%p124_p3), [#allocation2], %s337_s28 }
  0x39   : > { %491 = dma.done.wait (%p583_p8), %s130_s3, 1024  }
  0x3a   : > { %493 = vsyncadd (%p583_p8), %s130_s3, 4294966272  ;;  %v153_v0 = vld [vmem:[%s133_s4] sm:$0xff]  ;;  %v154_v1 = vld [vmem:[%s133_s4 + $0x8] sm:$0xff]  ;;  %vm217_vm0 = vcmask 1041409   ;;  %vm219_vm1 = vcmask 1042434   ;;  %s338_s18 = sshll.u32 %s648_s26, 3 }
  0x3b   : > { %v155_v2 = vld [vmem:[%s133_s4 + $0x10] sm:$0xff]  ;;  %v156_v3 = vld [vmem:[%s133_s4 + $0x18] sm:$0xff]  ;;  %v157_v4 = vld [vmem:[%s133_s4 + $0x20] sm:$0xff]  ;;  %v161_v6 = vrot.slane %v153_v0, 4  ;;  %v167_v7 = vrot.slane %v154_v1, 4  ;;  %vm221_vm2 = vcmask 1043459  }
  0x3c   : > { %v158_v5 = vld [vmem:[%s133_s4 + $0x28] sm:$0xff]  ;;  %v173_v8 = vrot.slane %v155_v2, 4  ;;  %v159_v9 = vld [vmem:[%s133_s4 + $0x30] sm:$0xff]  ;;  %v160_v10 = vld [vmem:[%s133_s4 + $0x38] sm:$0xff]  ;;  %v179_v11 = vrot.slane %v156_v3, 4  ;;  %v185_v12 = vrot.slane %v157_v4, 4 }
  0x3d   : > { %v191_v13 = vrot.slane %v158_v5, 4  ;;  %v162_v14 = vadd.f32 %v161_v6, %v153_v0  ;;  %v168_v15 = vadd.f32 %v167_v7, %v154_v1  ;;  %v197_v17 = vrot.slane %v159_v9, 4  ;;  %s151_s27 = scalar_lea.vmem [#allocation5], %s338_s18  ;;  %s340_s30 = sshll.u32 %s512_s9, 7 }
  0x3e   : > { %v174_v16 = vadd.f32 %v173_v8, %v155_v2  ;;  %v180_v18 = vadd.f32 %v179_v11, %v156_v3  ;;  %v186_v19 = vadd.f32 %v185_v12, %v157_v4  ;;  %v203_v21 = vrot.slane %v160_v10, 4  ;;  %s248_s29 = sshll.u32 %s151_s27, 4  ;;  %s665_s12 = scalar_lea.hbm %s713_s1, %s340_s30  ;;  %s660_s29 = int_to_ptr.vmem [resolvable:$true] %s248_s29 }
  0x3f   : > { %v192_v20 = vadd.f32 %v191_v13, %v158_v5  ;;  %v163_v22 = vrot.slane %v162_v14, 2  ;;  %v169_v23 = vrot.slane %v168_v15, 2  ;;  %v198_v25 = vadd.f32 %v197_v17, %v159_v9  ;;  %s234_s13 = scalar_lea.sflag [#allocation4], %s648_s26  ;;  %s438_s15 = scalar_lea.vmem %s660_s29, 128 }
  0x40   : > { %v175_v24 = vrot.slane %v174_v16, 2  ;;  %v181_v26 = vrot.slane %v180_v18, 2  ;;  %v187_v27 = vrot.slane %v186_v19, 2  ;;  %v204_v29 = vadd.f32 %v203_v21, %v160_v10  ;;  %p439_p8 = scmp.ne.s32.totalorder %s660_s29, %s438_s15  ;;  %p721_p9 = scmp.ne.s32.totalorder %s717_s19, 0 }
  0x41   : > { %v193_v28 = vrot.slane %v192_v20, 2  ;;  %v164_v30 = vadd.f32 %v163_v22, %v162_v14  ;;  %v170_v31 = vadd.f32 %v169_v23, %v168_v15  ;;  %v199_v33 = vrot.slane %v198_v25, 2  ;;  %s525_s9 = smov [#allocation5]  }
  0x42   : > { %v176_v32 = vadd.f32 %v175_v24, %v174_v16  ;;  %v182_v34 = vadd.f32 %v181_v26, %v180_v18  ;;  %v188_v35 = vadd.f32 %v187_v27, %v186_v19  ;;  %v205_v37 = vrot.slane %v204_v29, 2  ;;  %p440_p11 = pnand %p439_p8, %p721_p9  ;;  %s442_s16 = sshll.u32 %s525_s9, 4  ;;  %s443_s16 = int_to_ptr.vmem [resolvable:$false] %s442_s16 }
  0x43   : > { %v194_v36 = vadd.f32 %v193_v28, %v192_v20  ;;  %v165_v38 = vrot.slane %v164_v30, 1  ;;  %v171_v39 = vrot.slane %v170_v31, 1  ;;  %v200_v41 = vadd.f32 %v199_v33, %v198_v25  ;;  %s444_s17 = scalar_lea.vmem %s443_s16, 256  ;;  %p445_p6 = scmp.lt.s32.totalorder %s660_s29, %s443_s16 }
  0x44   : > { %v177_v40 = vrot.slane %v176_v32, 1  ;;  %v183_v42 = vrot.slane %v182_v34, 1  ;;  %v189_v43 = vrot.slane %v188_v35, 1  ;;  %v206_v45 = vadd.f32 %v205_v37, %v204_v29  ;;  %p441_p0 = pneg %p440_p11  ;;  %p446_p13 = scmp.lt.s32.totalorder %s444_s17, %s438_s15 }
  0x45   : > { %v195_v44 = vrot.slane %v194_v36, 1  ;;  %v166_v46 = vadd.f32 %v165_v38, %v164_v30  ;;  %v172_v47 = vadd.f32 %v171_v39, %v170_v31  ;;  %v201_v49 = vrot.slane %v200_v41, 1 }
  0x46   : > { %v178_v48 = vadd.f32 %v177_v40, %v176_v32  ;;  %v184_v50 = vadd.f32 %v183_v42, %v182_v34  ;;  %v190_v51 = vadd.f32 %v189_v43, %v188_v35  ;;  %v207_v52 = vrot.slane %v206_v45, 1  ;;  %p447_p2 = por %p446_p13, %p445_p6 }
  0x47   : > { %v196_v53 = vadd.f32 %v195_v44, %v194_v36  ;;  %v218_v54 = vsel %vm217_vm0, %v172_v47, %v166_v46  ;;  %vm223_vm3 = vcmask 1044484   ;;  %v202_v55 = vadd.f32 %v201_v49, %v200_v41 }
  0x48   : > { %v220_v56 = vsel %vm219_vm1, %v178_v48, %v218_v54  ;;  %vm225_vm4 = vcmask 1045509   ;;  %v208_v57 = vadd.f32 %v207_v52, %v206_v45  ;;  %vm227_vm5 = vcmask 1046534   ;;  %p448_p5 = pnand %p447_p2, %p441_p0 }
  0x49   : > { %v222_v58 = vsel %vm221_vm2, %v184_v50, %v220_v56  ;;  %vm229_vm6 = vcmask 1047559  }
  0x4a   : > { %v224_v59 = vsel %vm223_vm3, %v190_v51, %v222_v58 }
  0x4b   : > { %v226_v60 = vsel %vm225_vm4, %v196_v53, %v224_v59 }
  0x4c   : > { %v228_v61 = vsel %vm227_vm5, %v202_v55, %v226_v60 }
  0x4d   : > { %v230_v62 = vsel %vm229_vm6, %v208_v57, %v228_v61 }
  0x4e   : > { %232 = vst [vmem:[%s151_s27] sm:$0xff] %v230_v62 }
  0x4f   : > { %451 = shalt.err (!%p448_p5)
}
  0x50   : > { %s452_s22 = scalar_lea.hbm %s665_s12, 128  ;;  %s456_s25 = scalar_lea.hbm %s713_s1, 256 }
  0x51   : > { %p453_p4 = scmp.ne.s32.totalorder %s665_s12, %s452_s22  ;;  %p457_p12 = scmp.lt.u32.totalorder %s665_s12, %s713_s1 }
  0x52   : > { %p458_p1 = scmp.lt.u32.totalorder %s456_s25, %s452_s22  ;;  %p460_p8 = scmp.lt.u32.totalorder %s452_s22, %s665_s12 }
  0x53   : > { %p454_p7 = pnand %p453_p4, %p721_p9 }
  0x54   : > { %p459_p3 = por %p458_p1, %p457_p12 }
  0x55   : > { %p455_p10 = pneg %p454_p7 }
  0x56   : > { %p461_p11 = por %p460_p8, %p459_p3 }
  0x58   : > { %p462_p0 = pnand %p461_p11, %p455_p10 }
  0x5a   : > { %465 = shalt.err (!%p462_p0)
}
  0x5b   : > { %346 = dma.vmem_to_hbm [thread:$0]  (%p721_p9), %s660_s29, 128, %s665_s12, %s234_s13  }
  0x5c PF: > { %s260_s3 = sand.u32 1, %s500_s6   ;;  %p722_p6 = scmp.ne.s32.totalorder %s718_s21, 0 }
  0x5d   : > { %p723_p13 = scmp.ge.s32.totalorder %s520_s11, 2  ;;  %s261_s4 = scalar_lea.sflag [#allocation4], %s260_s3 }
  0x5f   : > { %p353_p2 = pnand %p723_p13, %p722_p6 }
  0x61   : > { %495 = dma.done.wait (!%p353_p2), %s261_s4, 128  }
  0x62   : > { %497 = vsyncadd (!%p353_p2), %s261_s4, 4294967168  ;;  %s17_s11 = sadd.s32 1, %s520_s11   ;;  %s724_s6 = smov %s504_s7 }
  0x63   : > { %p14_p5 = scmp.ge.s32.totalorder %s17_s11, 4   ;;  %s725_s7 = smov %s508_s8 }
  0x64   : > { %s726_s8 = smov %s592_s20  ;;  %s727_s9 = smov %s516_s10 }
  0x65   : > { %s728_s10 = smov %s730_s14  ;;  %16 = sbr.rel (!%p14_p5) target bundleno = 6 (0x6), region = 69 }
  0x6c   :  { %266 = vsyncpa [#allocation3], 1 }
  0x6d   :  { %268 = vsyncpa [#allocation3 + $0x1], 1 }
  0x6e   :  { %269 = vsyncpa [#allocation4], 1 }
  0x6f   :  { %271 = vsyncpa [#allocation4 + $0x1], 1 }

</bundles_post_ra>
